<compile_context>
chip_gen: v5e
topology: v5e:2x2
jax: 0.10.0
libtpu: 0.0.40
codegen_flags: <defaults>
</compile_context>

<pallas_src>
import jax
import jax.numpy as jnp
from jax.experimental import pallas as pl
from jax.experimental.pallas import tpu as pltpu

N_IN = 2
N_HID = 16


def mlp_kernel(x_ref, w1_ref, b1_ref, w2h_ref, b2h_ref, o_ref):
    # x_ref  : VMEM (2, S, 128)   feature planes; batch on sublanes x lanes
    # w1_ref : SMEM (32,)         layer-1 weights, unit-major flatten of (16, 2)
    # b1_ref : SMEM (16,)         layer-1 bias
    # w2h_ref: SMEM (16,)         0.5 * layer-2 weights (tanh-sigmoid fold)
    # b2h_ref: SMEM (1,)          0.5 * layer-2 bias
    # o_ref  : VMEM (S, 128)      probabilities
    x0 = x_ref[0]                                          # (S, 128)
    x1 = x_ref[1]                                          # (S, 128)

    # y accumulates 0.5 * (w2 @ relu(W1 x + b1) + b2), fully dense.
    y = jnp.full(x0.shape, b2h_ref[0], dtype=jnp.float32)
    for j in range(N_HID):                                 # unrolled scalar-splat FMAs (VPU)
        h = x0 * w1_ref[2 * j] + x1 * w1_ref[2 * j + 1] + b1_ref[j]
        h = jnp.maximum(h, 0.0)                            # ReLU
        y = y + w2h_ref[j] * h

    # sigmoid(z) = 0.5 * tanh(0.5 * z) + 0.5 ; the inner 0.5 lives in w2h/b2h.
    o_ref[...] = jnp.tanh(y) * 0.5 + 0.5


def _round_up(n, m):
    return ((n + m - 1) // m) * m


def _cdiv(a, b):
    return (a + b - 1) // b


def simple_classifier_forward(x, w1, b1, w2, b2, *, tb=65536):
    """Forward pass of SimpleClassifier: sigmoid(relu(x @ w1.T + b1) @ w2.T + b2).

    Args:
      x : (B, 2)   float-like
      w1: (16, 2)  PyTorch nn.Linear layout (out_features, in_features)
      b1: (16,)
      w2: (1, 16)
      b2: (1,)
      tb: requested batch-tile (elements) per grid step; internally rounded to a
          multiple of 1024 (= 8 sublanes x 128 lanes).
    Returns:
      (B, 1) float32 probabilities.
    """
    B = int(x.shape[0])

    # Batch laid out over sublanes x lanes: (2, nB, 128) with nB sublane-rows, 8-aligned.
    nB0 = _round_up(_cdiv(B, 128), 8)

    # Sublane-rows per grid step: multiple of 8, large enough to amortize the ~0.35us
    # per-step pipeline overhead, clamped so the grid has >=2 steps when the batch allows
    # (v7x megacore via dimension_semantics=("parallel",)).
    s_req = max(8, (int(tb) // 128 // 8) * 8)
    s_eff = min(s_req, max(8, _round_up(_cdiv(nB0, 2), 8)))

    # Round the row count so the grid exactly tiles the arrays (no partial edge blocks).
    nB = _round_up(nB0, s_eff)
    b_pad = nB * 128
    grid = (nB // s_eff,)

    # Single wrapper HBM pass: transpose (and pad, fused by XLA) then free reshapes.
    x_t = jnp.asarray(x, jnp.float32).T                    # (2, B)
    if b_pad != B:
        x_t = jnp.pad(x_t, ((0, 0), (0, b_pad - B)))
    x3 = x_t.reshape(2, nB, 128)

    # Parameters as SMEM scalars; fold the inner 0.5 of the tanh-sigmoid identity.
    w1k = jnp.asarray(w1, jnp.float32).reshape(2 * N_HID)  # [2*j + k] = w1[j, k]
    b1k = jnp.asarray(b1, jnp.float32).reshape(N_HID)
    w2hk = (0.5 * jnp.asarray(w2, jnp.float32)).reshape(N_HID)
    b2hk = (0.5 * jnp.asarray(b2, jnp.float32)).reshape(1)

    smem = pl.BlockSpec(memory_space=pltpu.MemorySpace.SMEM)

    out = pl.pallas_call(
        mlp_kernel,
        out_shape=jax.ShapeDtypeStruct((nB, 128), jnp.float32),
        grid=grid,
        in_specs=[
            # Streamed x tile: double-buffered by the Pallas pipeline.
            pl.BlockSpec((2, s_eff, 128), lambda i: (0, i, 0)),
            # Resident parameters in SMEM (copied once, ~65 scalars).
            smem, smem, smem, smem,
        ],
        out_specs=pl.BlockSpec((s_eff, 128), lambda i: (i, 0)),
        compiler_params=pltpu.CompilerParams(
            dimension_semantics=("parallel",),
        ),
        cost_estimate=pl.CostEstimate(
            flops=b_pad * (7 * N_HID + 3),
            transcendentals=b_pad,
            bytes_accessed=b_pad * 12,
        ),
    )(x3, w1k, b1k, w2hk, b2hk)

    # Back to the PyTorch-facing (B, 1) layout; drop padding (free reshape + small slice).
    return out.reshape(b_pad)[:B].reshape(B, 1)


def init_params(key):
    # PyTorch nn.Linear default init: U(-1/sqrt(fan_in), 1/sqrt(fan_in)), (out, in) layout.
    k1, k2, k3, k4 = jax.random.split(key, 4)
    bound1 = 1.0 / jnp.sqrt(2.0)
    bound2 = 1.0 / jnp.sqrt(16.0)
    w1 = jax.random.uniform(k1, (N_HID, N_IN), jnp.float32, -bound1, bound1)
    b1 = jax.random.uniform(k2, (N_HID,), jnp.float32, -bound1, bound1)
    w2 = jax.random.uniform(k3, (1, N_HID), jnp.float32, -bound2, bound2)
    b2 = jax.random.uniform(k4, (1,), jnp.float32, -bound2, bound2)
    return w1, b1, w2, b2


if __name__ == "__main__":
    key = jax.random.PRNGKey(0)
    k_x, k_x2, k_x3, k_p = jax.random.split(key, 4)
    w1, b1, w2, b2 = init_params(k_p)

    def ref_forward(xx):
        h = jnp.maximum(xx @ w1.T + b1, 0.0)
        return jax.nn.sigmoid(h @ w2.T + b2)

    # 1) Tiny batch: single grid step, heavy lane/row padding (sliced off).
    B = 8
    x = jax.random.normal(k_x, (B, 2), jnp.float32)
    out = jax.block_until_ready(simple_classifier_forward(x, w1, b1, w2, b2))
    assert out.shape == (B, 1)
    assert jnp.allclose(out, ref_forward(x), atol=1e-5, rtol=1e-5)

    # 2) Multi-step pipelined grid (B=2000 -> 16 rows of 128 lanes, 2 steps of 8 rows).
    B2 = 2000
    x2 = jax.random.normal(k_x2, (B2, 2), jnp.float32)
    out2 = jax.block_until_ready(
        simple_classifier_forward(x2, w1, b1, w2, b2, tb=1024))
    assert out2.shape == (B2, 1)
    assert jnp.allclose(out2, ref_forward(x2), atol=1e-5, rtol=1e-5)

    # 3) Non-multiple batch with row rounding (B=2300 -> 32 rows, 2 steps of 16 rows).
    B3 = 2300
    x3 = jax.random.normal(k_x3, (B3, 2), jnp.float32)
    out3 = jax.block_until_ready(
        simple_classifier_forward(x3, w1, b1, w2, b2, tb=2048))
    assert out3.shape == (B3, 1)
    assert jnp.allclose(out3, ref_forward(x3), atol=1e-5, rtol=1e-5)

    print("KERNEL_OK")
</pallas_src>

<mosaic_0001>
module attributes {stable_mosaic.version = 11 : i64} {
  func.func @mlp_kernel(%arg0: i32, %arg1: memref<2x8x128xf32, #tpu.memory_space<vmem>>, %arg2: memref<32xf32, #tpu.memory_space<smem>>, %arg3: memref<16xf32, #tpu.memory_space<smem>>, %arg4: memref<16xf32, #tpu.memory_space<smem>>, %arg5: memref<1xf32, #tpu.memory_space<smem>>, %arg6: memref<8x128xf32, #tpu.memory_space<vmem>>) attributes {dimension_semantics = [#tpu.dimension_semantics<parallel>], iteration_bounds = array<i64: 1>, scalar_prefetch = 0 : i64, scratch_operands = 0 : i64, tpu.core_type = #tpu.core_type<tc>, window_params = [{transform_indices = @transform_0, window_bounds = array<i64: 2, 8, 128>}, {transform_indices = @transform_1, window_bounds = array<i64: 32>}, {transform_indices = @transform_2, window_bounds = array<i64: 16>}, {transform_indices = @transform_3, window_bounds = array<i64: 16>}, {transform_indices = @transform_4, window_bounds = array<i64: 1>}, {transform_indices = @transform_5, window_bounds = array<i64: 8, 128>}]} {
    %c0 = arith.constant 0 : index
    %c0_0 = arith.constant 0 : index
    %c0_1 = arith.constant 0 : index
    %0 = vector.load %arg1[%c0, %c0_0, %c0_1] : memref<2x8x128xf32, #tpu.memory_space<vmem>>, vector<1x8x128xf32>
    %1 = vector.shape_cast %0 : vector<1x8x128xf32> to vector<8x128xf32>
    %c1 = arith.constant 1 : index
    %c0_2 = arith.constant 0 : index
    %c0_3 = arith.constant 0 : index
    %2 = vector.load %arg1[%c1, %c0_2, %c0_3] : memref<2x8x128xf32, #tpu.memory_space<vmem>>, vector<1x8x128xf32>
    %3 = vector.shape_cast %2 : vector<1x8x128xf32> to vector<8x128xf32>
    %c0_4 = arith.constant 0 : index
    %4 = memref.load %arg5[%c0_4] : memref<1xf32, #tpu.memory_space<smem>>
    %5 = vector.broadcast %4 : f32 to vector<8x128xf32>
    %c0_5 = arith.constant 0 : index
    %6 = memref.load %arg2[%c0_5] : memref<32xf32, #tpu.memory_space<smem>>
    %7 = vector.broadcast %6 : f32 to vector<8x128xf32>
    %8 = arith.mulf %1, %7 : vector<8x128xf32>
    %c1_6 = arith.constant 1 : index
    %9 = memref.load %arg2[%c1_6] : memref<32xf32, #tpu.memory_space<smem>>
    %10 = vector.broadcast %9 : f32 to vector<8x128xf32>
    %11 = arith.mulf %3, %10 : vector<8x128xf32>
    %12 = arith.addf %8, %11 : vector<8x128xf32>
    %c0_7 = arith.constant 0 : index
    %13 = memref.load %arg3[%c0_7] : memref<16xf32, #tpu.memory_space<smem>>
    %14 = vector.broadcast %13 : f32 to vector<8x128xf32>
    %15 = arith.addf %12, %14 : vector<8x128xf32>
    %cst = arith.constant 0.000000e+00 : f32
    %16 = vector.broadcast %cst : f32 to vector<8x128xf32>
    %17 = arith.maximumf %15, %16 : vector<8x128xf32>
    %c0_8 = arith.constant 0 : index
    %18 = memref.load %arg4[%c0_8] : memref<16xf32, #tpu.memory_space<smem>>
    %19 = vector.broadcast %18 : f32 to vector<8x128xf32>
    %20 = arith.mulf %19, %17 : vector<8x128xf32>
    %21 = arith.addf %5, %20 : vector<8x128xf32>
    %c2 = arith.constant 2 : index
    %22 = memref.load %arg2[%c2] : memref<32xf32, #tpu.memory_space<smem>>
    %23 = vector.broadcast %22 : f32 to vector<8x128xf32>
    %24 = arith.mulf %1, %23 : vector<8x128xf32>
    %c3 = arith.constant 3 : index
    %25 = memref.load %arg2[%c3] : memref<32xf32, #tpu.memory_space<smem>>
    %26 = vector.broadcast %25 : f32 to vector<8x128xf32>
    %27 = arith.mulf %3, %26 : vector<8x128xf32>
    %28 = arith.addf %24, %27 : vector<8x128xf32>
    %c1_9 = arith.constant 1 : index
    %29 = memref.load %arg3[%c1_9] : memref<16xf32, #tpu.memory_space<smem>>
    %30 = vector.broadcast %29 : f32 to vector<8x128xf32>
    %31 = arith.addf %28, %30 : vector<8x128xf32>
    %cst_10 = arith.constant 0.000000e+00 : f32
    %32 = vector.broadcast %cst_10 : f32 to vector<8x128xf32>
    %33 = arith.maximumf %31, %32 : vector<8x128xf32>
    %c1_11 = arith.constant 1 : index
    %34 = memref.load %arg4[%c1_11] : memref<16xf32, #tpu.memory_space<smem>>
    %35 = vector.broadcast %34 : f32 to vector<8x128xf32>
    %36 = arith.mulf %35, %33 : vector<8x128xf32>
    %37 = arith.addf %21, %36 : vector<8x128xf32>
    %c4 = arith.constant 4 : index
    %38 = memref.load %arg2[%c4] : memref<32xf32, #tpu.memory_space<smem>>
    %39 = vector.broadcast %38 : f32 to vector<8x128xf32>
    %40 = arith.mulf %1, %39 : vector<8x128xf32>
    %c5 = arith.constant 5 : index
    %41 = memref.load %arg2[%c5] : memref<32xf32, #tpu.memory_space<smem>>
    %42 = vector.broadcast %41 : f32 to vector<8x128xf32>
    %43 = arith.mulf %3, %42 : vector<8x128xf32>
    %44 = arith.addf %40, %43 : vector<8x128xf32>
    %c2_12 = arith.constant 2 : index
    %45 = memref.load %arg3[%c2_12] : memref<16xf32, #tpu.memory_space<smem>>
    %46 = vector.broadcast %45 : f32 to vector<8x128xf32>
    %47 = arith.addf %44, %46 : vector<8x128xf32>
    %cst_13 = arith.constant 0.000000e+00 : f32
    %48 = vector.broadcast %cst_13 : f32 to vector<8x128xf32>
    %49 = arith.maximumf %47, %48 : vector<8x128xf32>
    %c2_14 = arith.constant 2 : index
    %50 = memref.load %arg4[%c2_14] : memref<16xf32, #tpu.memory_space<smem>>
    %51 = vector.broadcast %50 : f32 to vector<8x128xf32>
    %52 = arith.mulf %51, %49 : vector<8x128xf32>
    %53 = arith.addf %37, %52 : vector<8x128xf32>
    %c6 = arith.constant 6 : index
    %54 = memref.load %arg2[%c6] : memref<32xf32, #tpu.memory_space<smem>>
    %55 = vector.broadcast %54 : f32 to vector<8x128xf32>
    %56 = arith.mulf %1, %55 : vector<8x128xf32>
    %c7 = arith.constant 7 : index
    %57 = memref.load %arg2[%c7] : memref<32xf32, #tpu.memory_space<smem>>
    %58 = vector.broadcast %57 : f32 to vector<8x128xf32>
    %59 = arith.mulf %3, %58 : vector<8x128xf32>
    %60 = arith.addf %56, %59 : vector<8x128xf32>
    %c3_15 = arith.constant 3 : index
    %61 = memref.load %arg3[%c3_15] : memref<16xf32, #tpu.memory_space<smem>>
    %62 = vector.broadcast %61 : f32 to vector<8x128xf32>
    %63 = arith.addf %60, %62 : vector<8x128xf32>
    %cst_16 = arith.constant 0.000000e+00 : f32
    %64 = vector.broadcast %cst_16 : f32 to vector<8x128xf32>
    %65 = arith.maximumf %63, %64 : vector<8x128xf32>
    %c3_17 = arith.constant 3 : index
    %66 = memref.load %arg4[%c3_17] : memref<16xf32, #tpu.memory_space<smem>>
    %67 = vector.broadcast %66 : f32 to vector<8x128xf32>
    %68 = arith.mulf %67, %65 : vector<8x128xf32>
    %69 = arith.addf %53, %68 : vector<8x128xf32>
    %c8 = arith.constant 8 : index
    %70 = memref.load %arg2[%c8] : memref<32xf32, #tpu.memory_space<smem>>
    %71 = vector.broadcast %70 : f32 to vector<8x128xf32>
    %72 = arith.mulf %1, %71 : vector<8x128xf32>
    %c9 = arith.constant 9 : index
    %73 = memref.load %arg2[%c9] : memref<32xf32, #tpu.memory_space<smem>>
    %74 = vector.broadcast %73 : f32 to vector<8x128xf32>
    %75 = arith.mulf %3, %74 : vector<8x128xf32>
    %76 = arith.addf %72, %75 : vector<8x128xf32>
    %c4_18 = arith.constant 4 : index
    %77 = memref.load %arg3[%c4_18] : memref<16xf32, #tpu.memory_space<smem>>
    %78 = vector.broadcast %77 : f32 to vector<8x128xf32>
    %79 = arith.addf %76, %78 : vector<8x128xf32>
    %cst_19 = arith.constant 0.000000e+00 : f32
    %80 = vector.broadcast %cst_19 : f32 to vector<8x128xf32>
    %81 = arith.maximumf %79, %80 : vector<8x128xf32>
    %c4_20 = arith.constant 4 : index
    %82 = memref.load %arg4[%c4_20] : memref<16xf32, #tpu.memory_space<smem>>
    %83 = vector.broadcast %82 : f32 to vector<8x128xf32>
    %84 = arith.mulf %83, %81 : vector<8x128xf32>
    %85 = arith.addf %69, %84 : vector<8x128xf32>
    %c10 = arith.constant 10 : index
    %86 = memref.load %arg2[%c10] : memref<32xf32, #tpu.memory_space<smem>>
    %87 = vector.broadcast %86 : f32 to vector<8x128xf32>
    %88 = arith.mulf %1, %87 : vector<8x128xf32>
    %c11 = arith.constant 11 : index
    %89 = memref.load %arg2[%c11] : memref<32xf32, #tpu.memory_space<smem>>
    %90 = vector.broadcast %89 : f32 to vector<8x128xf32>
    %91 = arith.mulf %3, %90 : vector<8x128xf32>
    %92 = arith.addf %88, %91 : vector<8x128xf32>
    %c5_21 = arith.constant 5 : index
    %93 = memref.load %arg3[%c5_21] : memref<16xf32, #tpu.memory_space<smem>>
    %94 = vector.broadcast %93 : f32 to vector<8x128xf32>
    %95 = arith.addf %92, %94 : vector<8x128xf32>
    %cst_22 = arith.constant 0.000000e+00 : f32
    %96 = vector.broadcast %cst_22 : f32 to vector<8x128xf32>
    %97 = arith.maximumf %95, %96 : vector<8x128xf32>
    %c5_23 = arith.constant 5 : index
    %98 = memref.load %arg4[%c5_23] : memref<16xf32, #tpu.memory_space<smem>>
    %99 = vector.broadcast %98 : f32 to vector<8x128xf32>
    %100 = arith.mulf %99, %97 : vector<8x128xf32>
    %101 = arith.addf %85, %100 : vector<8x128xf32>
    %c12 = arith.constant 12 : index
    %102 = memref.load %arg2[%c12] : memref<32xf32, #tpu.memory_space<smem>>
    %103 = vector.broadcast %102 : f32 to vector<8x128xf32>
    %104 = arith.mulf %1, %103 : vector<8x128xf32>
    %c13 = arith.constant 13 : index
    %105 = memref.load %arg2[%c13] : memref<32xf32, #tpu.memory_space<smem>>
    %106 = vector.broadcast %105 : f32 to vector<8x128xf32>
    %107 = arith.mulf %3, %106 : vector<8x128xf32>
    %108 = arith.addf %104, %107 : vector<8x128xf32>
    %c6_24 = arith.constant 6 : index
    %109 = memref.load %arg3[%c6_24] : memref<16xf32, #tpu.memory_space<smem>>
    %110 = vector.broadcast %109 : f32 to vector<8x128xf32>
    %111 = arith.addf %108, %110 : vector<8x128xf32>
    %cst_25 = arith.constant 0.000000e+00 : f32
    %112 = vector.broadcast %cst_25 : f32 to vector<8x128xf32>
    %113 = arith.maximumf %111, %112 : vector<8x128xf32>
    %c6_26 = arith.constant 6 : index
    %114 = memref.load %arg4[%c6_26] : memref<16xf32, #tpu.memory_space<smem>>
    %115 = vector.broadcast %114 : f32 to vector<8x128xf32>
    %116 = arith.mulf %115, %113 : vector<8x128xf32>
    %117 = arith.addf %101, %116 : vector<8x128xf32>
    %c14 = arith.constant 14 : index
    %118 = memref.load %arg2[%c14] : memref<32xf32, #tpu.memory_space<smem>>
    %119 = vector.broadcast %118 : f32 to vector<8x128xf32>
    %120 = arith.mulf %1, %119 : vector<8x128xf32>
    %c15 = arith.constant 15 : index
    %121 = memref.load %arg2[%c15] : memref<32xf32, #tpu.memory_space<smem>>
    %122 = vector.broadcast %121 : f32 to vector<8x128xf32>
    %123 = arith.mulf %3, %122 : vector<8x128xf32>
    %124 = arith.addf %120, %123 : vector<8x128xf32>
    %c7_27 = arith.constant 7 : index
    %125 = memref.load %arg3[%c7_27] : memref<16xf32, #tpu.memory_space<smem>>
    %126 = vector.broadcast %125 : f32 to vector<8x128xf32>
    %127 = arith.addf %124, %126 : vector<8x128xf32>
    %cst_28 = arith.constant 0.000000e+00 : f32
    %128 = vector.broadcast %cst_28 : f32 to vector<8x128xf32>
    %129 = arith.maximumf %127, %128 : vector<8x128xf32>
    %c7_29 = arith.constant 7 : index
    %130 = memref.load %arg4[%c7_29] : memref<16xf32, #tpu.memory_space<smem>>
    %131 = vector.broadcast %130 : f32 to vector<8x128xf32>
    %132 = arith.mulf %131, %129 : vector<8x128xf32>
    %133 = arith.addf %117, %132 : vector<8x128xf32>
    %c16 = arith.constant 16 : index
    %134 = memref.load %arg2[%c16] : memref<32xf32, #tpu.memory_space<smem>>
    %135 = vector.broadcast %134 : f32 to vector<8x128xf32>
    %136 = arith.mulf %1, %135 : vector<8x128xf32>
    %c17 = arith.constant 17 : index
    %137 = memref.load %arg2[%c17] : memref<32xf32, #tpu.memory_space<smem>>
    %138 = vector.broadcast %137 : f32 to vector<8x128xf32>
    %139 = arith.mulf %3, %138 : vector<8x128xf32>
    %140 = arith.addf %136, %139 : vector<8x128xf32>
    %c8_30 = arith.constant 8 : index
    %141 = memref.load %arg3[%c8_30] : memref<16xf32, #tpu.memory_space<smem>>
    %142 = vector.broadcast %141 : f32 to vector<8x128xf32>
    %143 = arith.addf %140, %142 : vector<8x128xf32>
    %cst_31 = arith.constant 0.000000e+00 : f32
    %144 = vector.broadcast %cst_31 : f32 to vector<8x128xf32>
    %145 = arith.maximumf %143, %144 : vector<8x128xf32>
    %c8_32 = arith.constant 8 : index
    %146 = memref.load %arg4[%c8_32] : memref<16xf32, #tpu.memory_space<smem>>
    %147 = vector.broadcast %146 : f32 to vector<8x128xf32>
    %148 = arith.mulf %147, %145 : vector<8x128xf32>
    %149 = arith.addf %133, %148 : vector<8x128xf32>
    %c18 = arith.constant 18 : index
    %150 = memref.load %arg2[%c18] : memref<32xf32, #tpu.memory_space<smem>>
    %151 = vector.broadcast %150 : f32 to vector<8x128xf32>
    %152 = arith.mulf %1, %151 : vector<8x128xf32>
    %c19 = arith.constant 19 : index
    %153 = memref.load %arg2[%c19] : memref<32xf32, #tpu.memory_space<smem>>
    %154 = vector.broadcast %153 : f32 to vector<8x128xf32>
    %155 = arith.mulf %3, %154 : vector<8x128xf32>
    %156 = arith.addf %152, %155 : vector<8x128xf32>
    %c9_33 = arith.constant 9 : index
    %157 = memref.load %arg3[%c9_33] : memref<16xf32, #tpu.memory_space<smem>>
    %158 = vector.broadcast %157 : f32 to vector<8x128xf32>
    %159 = arith.addf %156, %158 : vector<8x128xf32>
    %cst_34 = arith.constant 0.000000e+00 : f32
    %160 = vector.broadcast %cst_34 : f32 to vector<8x128xf32>
    %161 = arith.maximumf %159, %160 : vector<8x128xf32>
    %c9_35 = arith.constant 9 : index
    %162 = memref.load %arg4[%c9_35] : memref<16xf32, #tpu.memory_space<smem>>
    %163 = vector.broadcast %162 : f32 to vector<8x128xf32>
    %164 = arith.mulf %163, %161 : vector<8x128xf32>
    %165 = arith.addf %149, %164 : vector<8x128xf32>
    %c20 = arith.constant 20 : index
    %166 = memref.load %arg2[%c20] : memref<32xf32, #tpu.memory_space<smem>>
    %167 = vector.broadcast %166 : f32 to vector<8x128xf32>
    %168 = arith.mulf %1, %167 : vector<8x128xf32>
    %c21 = arith.constant 21 : index
    %169 = memref.load %arg2[%c21] : memref<32xf32, #tpu.memory_space<smem>>
    %170 = vector.broadcast %169 : f32 to vector<8x128xf32>
    %171 = arith.mulf %3, %170 : vector<8x128xf32>
    %172 = arith.addf %168, %171 : vector<8x128xf32>
    %c10_36 = arith.constant 10 : index
    %173 = memref.load %arg3[%c10_36] : memref<16xf32, #tpu.memory_space<smem>>
    %174 = vector.broadcast %173 : f32 to vector<8x128xf32>
    %175 = arith.addf %172, %174 : vector<8x128xf32>
    %cst_37 = arith.constant 0.000000e+00 : f32
    %176 = vector.broadcast %cst_37 : f32 to vector<8x128xf32>
    %177 = arith.maximumf %175, %176 : vector<8x128xf32>
    %c10_38 = arith.constant 10 : index
    %178 = memref.load %arg4[%c10_38] : memref<16xf32, #tpu.memory_space<smem>>
    %179 = vector.broadcast %178 : f32 to vector<8x128xf32>
    %180 = arith.mulf %179, %177 : vector<8x128xf32>
    %181 = arith.addf %165, %180 : vector<8x128xf32>
    %c22 = arith.constant 22 : index
    %182 = memref.load %arg2[%c22] : memref<32xf32, #tpu.memory_space<smem>>
    %183 = vector.broadcast %182 : f32 to vector<8x128xf32>
    %184 = arith.mulf %1, %183 : vector<8x128xf32>
    %c23 = arith.constant 23 : index
    %185 = memref.load %arg2[%c23] : memref<32xf32, #tpu.memory_space<smem>>
    %186 = vector.broadcast %185 : f32 to vector<8x128xf32>
    %187 = arith.mulf %3, %186 : vector<8x128xf32>
    %188 = arith.addf %184, %187 : vector<8x128xf32>
    %c11_39 = arith.constant 11 : index
    %189 = memref.load %arg3[%c11_39] : memref<16xf32, #tpu.memory_space<smem>>
    %190 = vector.broadcast %189 : f32 to vector<8x128xf32>
    %191 = arith.addf %188, %190 : vector<8x128xf32>
    %cst_40 = arith.constant 0.000000e+00 : f32
    %192 = vector.broadcast %cst_40 : f32 to vector<8x128xf32>
    %193 = arith.maximumf %191, %192 : vector<8x128xf32>
    %c11_41 = arith.constant 11 : index
    %194 = memref.load %arg4[%c11_41] : memref<16xf32, #tpu.memory_space<smem>>
    %195 = vector.broadcast %194 : f32 to vector<8x128xf32>
    %196 = arith.mulf %195, %193 : vector<8x128xf32>
    %197 = arith.addf %181, %196 : vector<8x128xf32>
    %c24 = arith.constant 24 : index
    %198 = memref.load %arg2[%c24] : memref<32xf32, #tpu.memory_space<smem>>
    %199 = vector.broadcast %198 : f32 to vector<8x128xf32>
    %200 = arith.mulf %1, %199 : vector<8x128xf32>
    %c25 = arith.constant 25 : index
    %201 = memref.load %arg2[%c25] : memref<32xf32, #tpu.memory_space<smem>>
    %202 = vector.broadcast %201 : f32 to vector<8x128xf32>
    %203 = arith.mulf %3, %202 : vector<8x128xf32>
    %204 = arith.addf %200, %203 : vector<8x128xf32>
    %c12_42 = arith.constant 12 : index
    %205 = memref.load %arg3[%c12_42] : memref<16xf32, #tpu.memory_space<smem>>
    %206 = vector.broadcast %205 : f32 to vector<8x128xf32>
    %207 = arith.addf %204, %206 : vector<8x128xf32>
    %cst_43 = arith.constant 0.000000e+00 : f32
    %208 = vector.broadcast %cst_43 : f32 to vector<8x128xf32>
    %209 = arith.maximumf %207, %208 : vector<8x128xf32>
    %c12_44 = arith.constant 12 : index
    %210 = memref.load %arg4[%c12_44] : memref<16xf32, #tpu.memory_space<smem>>
    %211 = vector.broadcast %210 : f32 to vector<8x128xf32>
    %212 = arith.mulf %211, %209 : vector<8x128xf32>
    %213 = arith.addf %197, %212 : vector<8x128xf32>
    %c26 = arith.constant 26 : index
    %214 = memref.load %arg2[%c26] : memref<32xf32, #tpu.memory_space<smem>>
    %215 = vector.broadcast %214 : f32 to vector<8x128xf32>
    %216 = arith.mulf %1, %215 : vector<8x128xf32>
    %c27 = arith.constant 27 : index
    %217 = memref.load %arg2[%c27] : memref<32xf32, #tpu.memory_space<smem>>
    %218 = vector.broadcast %217 : f32 to vector<8x128xf32>
    %219 = arith.mulf %3, %218 : vector<8x128xf32>
    %220 = arith.addf %216, %219 : vector<8x128xf32>
    %c13_45 = arith.constant 13 : index
    %221 = memref.load %arg3[%c13_45] : memref<16xf32, #tpu.memory_space<smem>>
    %222 = vector.broadcast %221 : f32 to vector<8x128xf32>
    %223 = arith.addf %220, %222 : vector<8x128xf32>
    %cst_46 = arith.constant 0.000000e+00 : f32
    %224 = vector.broadcast %cst_46 : f32 to vector<8x128xf32>
    %225 = arith.maximumf %223, %224 : vector<8x128xf32>
    %c13_47 = arith.constant 13 : index
    %226 = memref.load %arg4[%c13_47] : memref<16xf32, #tpu.memory_space<smem>>
    %227 = vector.broadcast %226 : f32 to vector<8x128xf32>
    %228 = arith.mulf %227, %225 : vector<8x128xf32>
    %229 = arith.addf %213, %228 : vector<8x128xf32>
    %c28 = arith.constant 28 : index
    %230 = memref.load %arg2[%c28] : memref<32xf32, #tpu.memory_space<smem>>
    %231 = vector.broadcast %230 : f32 to vector<8x128xf32>
    %232 = arith.mulf %1, %231 : vector<8x128xf32>
    %c29 = arith.constant 29 : index
    %233 = memref.load %arg2[%c29] : memref<32xf32, #tpu.memory_space<smem>>
    %234 = vector.broadcast %233 : f32 to vector<8x128xf32>
    %235 = arith.mulf %3, %234 : vector<8x128xf32>
    %236 = arith.addf %232, %235 : vector<8x128xf32>
    %c14_48 = arith.constant 14 : index
    %237 = memref.load %arg3[%c14_48] : memref<16xf32, #tpu.memory_space<smem>>
    %238 = vector.broadcast %237 : f32 to vector<8x128xf32>
    %239 = arith.addf %236, %238 : vector<8x128xf32>
    %cst_49 = arith.constant 0.000000e+00 : f32
    %240 = vector.broadcast %cst_49 : f32 to vector<8x128xf32>
    %241 = arith.maximumf %239, %240 : vector<8x128xf32>
    %c14_50 = arith.constant 14 : index
    %242 = memref.load %arg4[%c14_50] : memref<16xf32, #tpu.memory_space<smem>>
    %243 = vector.broadcast %242 : f32 to vector<8x128xf32>
    %244 = arith.mulf %243, %241 : vector<8x128xf32>
    %245 = arith.addf %229, %244 : vector<8x128xf32>
    %c30 = arith.constant 30 : index
    %246 = memref.load %arg2[%c30] : memref<32xf32, #tpu.memory_space<smem>>
    %247 = vector.broadcast %246 : f32 to vector<8x128xf32>
    %248 = arith.mulf %1, %247 : vector<8x128xf32>
    %c31 = arith.constant 31 : index
    %249 = memref.load %arg2[%c31] : memref<32xf32, #tpu.memory_space<smem>>
    %250 = vector.broadcast %249 : f32 to vector<8x128xf32>
    %251 = arith.mulf %3, %250 : vector<8x128xf32>
    %252 = arith.addf %248, %251 : vector<8x128xf32>
    %c15_51 = arith.constant 15 : index
    %253 = memref.load %arg3[%c15_51] : memref<16xf32, #tpu.memory_space<smem>>
    %254 = vector.broadcast %253 : f32 to vector<8x128xf32>
    %255 = arith.addf %252, %254 : vector<8x128xf32>
    %cst_52 = arith.constant 0.000000e+00 : f32
    %256 = vector.broadcast %cst_52 : f32 to vector<8x128xf32>
    %257 = arith.maximumf %255, %256 : vector<8x128xf32>
    %c15_53 = arith.constant 15 : index
    %258 = memref.load %arg4[%c15_53] : memref<16xf32, #tpu.memory_space<smem>>
    %259 = vector.broadcast %258 : f32 to vector<8x128xf32>
    %260 = arith.mulf %259, %257 : vector<8x128xf32>
    %261 = arith.addf %245, %260 : vector<8x128xf32>
    %262 = math.tanh %261 : vector<8x128xf32>
    %cst_54 = arith.constant 5.000000e-01 : f32
    %263 = vector.broadcast %cst_54 : f32 to vector<8x128xf32>
    %264 = arith.mulf %262, %263 : vector<8x128xf32>
    %cst_55 = arith.constant 5.000000e-01 : f32
    %265 = vector.broadcast %cst_55 : f32 to vector<8x128xf32>
    %266 = arith.addf %264, %265 : vector<8x128xf32>
    %c0_56 = arith.constant 0 : index
    %c0_57 = arith.constant 0 : index
    %267 = vector.load %arg6[%c0_56, %c0_57] : memref<8x128xf32, #tpu.memory_space<vmem>>, vector<8x128xf32>
    tpu.vector_store %arg6[%c0_56, %c0_57], %266 {strides = array<i32>} : memref<8x128xf32, #tpu.memory_space<vmem>>, vector<8x128xf32>,
    return
  }
  func.func @transform_0(%arg0: i32) -> (i32, i32, i32) {
    %c0_i32 = arith.constant 0 : i32
    %c0_i32_0 = arith.constant 0 : i32
    %c0_i32_1 = arith.constant 0 : i32
    return %c0_i32, %arg0, %c0_i32_0 : i32, i32, i32
  }
  func.func @transform_1(%arg0: i32) -> i32 {
    %c0_i32 = arith.constant 0 : i32
    %c0_i32_0 = arith.constant 0 : i32
    return %c0_i32 : i32
  }
  func.func @transform_2(%arg0: i32) -> i32 {
    %c0_i32 = arith.constant 0 : i32
    %c0_i32_0 = arith.constant 0 : i32
    return %c0_i32 : i32
  }
  func.func @transform_3(%arg0: i32) -> i32 {
    %c0_i32 = arith.constant 0 : i32
    %c0_i32_0 = arith.constant 0 : i32
    return %c0_i32 : i32
  }
  func.func @transform_4(%arg0: i32) -> i32 {
    %c0_i32 = arith.constant 0 : i32
    %c0_i32_0 = arith.constant 0 : i32
    return %c0_i32 : i32
  }
  func.func @transform_5(%arg0: i32) -> (i32, i32) {
    %c0_i32 = arith.constant 0 : i32
    %c0_i32_0 = arith.constant 0 : i32
    return %arg0, %c0_i32 : i32, i32
  }
}

</mosaic_0001>

<bundles_post_ra>
// kernel: tpu_custom_call.1
= control target key start
LH: loop header
LB: loop body
LE: loop exit
PB: predicated region body
PF: predicated region fallthrough
CT: control target
= control target key end

     0   :  { %11 = vsyncpa [#allocation4], 0  ;;  %s679_s0 = inlined_call_operand.hbm [shape: f32[2,8,128], index: 0, kind: input, shape index: {}]   ;;  %s680_s1 = inlined_call_operand.vmem [shape: f32[32], index: 1, kind: input, shape index: {}]   ;;  %s681_s2 = inlined_call_operand.vmem [shape: f32[16], index: 2, kind: input, shape index: {}]   ;;  %s682_s3 = inlined_call_operand.vmem [shape: f32[16], index: 3, kind: input, shape index: {}]   ;;  %s683_s4 = inlined_call_operand.<no memory space> [shape: f32[1], index: 4, kind: input, shape index: {}]   ;;  %s684_s5 = inlined_call_operand.hbm [shape: f32[8,128], index: 5, kind: output, shape index: {}]  }
   0x1   :  { %12 = vsyncpa [#allocation6], 0 }
   0x2   :  { %13 = vsyncpa [#allocation9], 0  ;;  %s42_s20 = sshll.u32 %s681_s2, 4  ;;  %s43_s20 = int_to_ptr.vmem [resolvable:$true] %s42_s20 }
   0x3   :  { %14 = vsyncpa [#allocation5], 0  ;;  %s19_s23 = sshll.u32 %s679_s0, 4  ;;  %s504_s24 = smov [#allocation8]   ;;  %s20_s23 = int_to_ptr.hbm [resolvable:$true] %s19_s23 }
   0x4   :  { %45 = dma.vmem_to_smem %s43_s20, 16, %s504_s24, [#allocation9]  }
   0x5   :  { %s505_s25 = smov [#allocation3]   ;;  %s506_s27 = smov 128  }
   0x6   :  { %s21_s26 = sshll.u32 %s505_s25, 4  ;;  %s507_s28 = smov 8   ;;  %s22_s26 = int_to_ptr.vmem [resolvable:$true] %s21_s26 }
   0x7   :  { %27 = dma.hbm_to_vmem [thread:$0]  %s20_s23, 256, %s22_s26, [#allocation4], %s506_s27, %s506_s27, %s507_s28  }
   0x8   :  { %s33_s6 = sshll.u32 %s680_s1, 4  ;;  %s51_s8 = sshll.u32 %s682_s3, 4  ;;  %s34_s6 = int_to_ptr.vmem [resolvable:$true] %s33_s6  ;;  %s52_s8 = int_to_ptr.vmem [resolvable:$true] %s51_s8 }
   0x9   :  { %s508_s9 = smov [#allocation7]   ;;  %s509_s0 = smov [#allocation10]  }
   0xa   :  { %36 = dma.vmem_to_smem %s34_s6, 16, %s508_s9, [#allocation6]  }
   0xb   :  { %54 = dma.vmem_to_smem %s52_s8, 16, %s509_s0, [#allocation9]  }
   0xc   :  { %496 = dma.done.wait [#allocation4], 256  }
   0xd   :  { %497 = vsyncadd [#allocation4], 4294967040 }
   0xe   :  { %498 = dma.done.wait [#allocation6], 16  }
   0xf   :  { %499 = vsyncadd [#allocation6], 4294967280 }
  0x10   :  { %500 = dma.done.wait [#allocation9], 32  }
  0x11   :  { %501 = vsyncadd [#allocation9], 4294967264 }
  0x12   :  { %73 = sfence }
  0x13   :  { %s79_s10 = sld [smem:[#allocation7]]  ;;  %v555_v0 = vld [vmem:[#allocation3] sm:$0xff]  ;;  %v557_v1 = vld [vmem:[#allocation3 + $0x8] sm:$0xff]  ;;  %v78_v18 = vstv %s683_s4 }
  0x14   :  { %s342_s11 = sld [smem:[#allocation7 + $0x1]] }
  0x15   :  { %s86_s1 = sld [smem:[#allocation8]] }
  0x16   :  { %s553_s12 = sld [smem:[#allocation10]] }
  0x17   :  { %s343_s3 = sld [smem:[#allocation7 + $0x2]] }
  0x18   :  { %s344_s13 = sld [smem:[#allocation7 + $0x3]] }
  0x19   :  { %v80_v2 = vstv %s79_s10  ;;  %s345_s14 = sld [smem:[#allocation8 + $0x1]] }
  0x1a   :  { %v81_v3 = vmul.f32 %v80_v2, %v555_v0  ;;  %v83_v4 = vstv %s342_s11  ;;  %s560_s15 = sld [smem:[#allocation10 + $0x1]] }
  0x1b   :  { %v84_v5 = vmul.f32 %v83_v4, %v557_v1  ;;  %s347_s16 = sld [smem:[#allocation7 + $0x4]]  ;;  %v87_v6 = vstv %s86_s1 }
  0x1c   :  { %s348_s17 = sld [smem:[#allocation7 + $0x5]]  ;;  %v91_v13 = vstv %s553_s12 }
  0x1d   :  { %v85_v7 = vadd.f32 %v84_v5, %v81_v3  ;;  %v95_v8 = vstv %s343_s3  ;;  %s563_s18 = sld [smem:[#allocation8 + $0x2]] }
  0x1e   :  { %v96_v9 = vmul.f32 %v95_v8, %v555_v0  ;;  %v98_v10 = vstv %s344_s13  ;;  %s566_s19 = sld [smem:[#allocation10 + $0x2]] }
  0x1f   :  { %v88_v11 = vadd.f32 %v87_v6, %v85_v7  ;;  %v99_v12 = vmul.f32 %v98_v10, %v557_v1  ;;  %s351_s20 = sld [smem:[#allocation7 + $0x6]]  ;;  %v102_v14 = vstv %s345_s14 }
  0x20   :  { %s352_s21 = sld [smem:[#allocation7 + $0x7]]  ;;  %v106_v24 = vstv %s560_s15 }
  0x21   :  { %v89_v15 = vmax.f32 %v88_v11, 0.0  ;;  %v100_v16 = vadd.f32 %v99_v12, %v96_v9  ;;  %v110_v17 = vstv %s347_s16  ;;  %s570_s22 = sld [smem:[#allocation8 + $0x3]] }
  0x22   :  { %v111_v19 = vmul.f32 %v110_v17, %v555_v0  ;;  %v113_v20 = vstv %s348_s17  ;;  %s576_s25 = sld [smem:[#allocation10 + $0x3]] }
  0x23   :  { %v92_v21 = vmul.f32 %v91_v13, %v89_v15  ;;  %v103_v22 = vadd.f32 %v102_v14, %v100_v16  ;;  %v114_v23 = vmul.f32 %v113_v20, %v557_v1  ;;  %s355_s26 = sld [smem:[#allocation7 + $0x8]]  ;;  %v117_v25 = vstv %s563_s18 }
  0x24   :  { %s356_s27 = sld [smem:[#allocation7 + $0x9]]  ;;  %v121_v35 = vstv %s566_s19 }
  0x25   :  { %v93_v26 = vadd.f32 %v92_v21, %v78_v18  ;;  %v104_v27 = vmax.f32 %v103_v22, 0.0  ;;  %v115_v28 = vadd.f32 %v114_v23, %v111_v19  ;;  %v125_v29 = vstv %s351_s20  ;;  %s581_s4 = sld [smem:[#allocation8 + $0x4]] }
  0x26   :  { %v126_v30 = vmul.f32 %v125_v29, %v555_v0  ;;  %v128_v31 = vstv %s352_s21  ;;  %s584_s28 = sld [smem:[#allocation10 + $0x4]] }
  0x27   :  { %v107_v32 = vmul.f32 %v106_v24, %v104_v27  ;;  %v118_v33 = vadd.f32 %v117_v25, %v115_v28  ;;  %v129_v34 = vmul.f32 %v128_v31, %v557_v1  ;;  %s359_s29 = sld [smem:[#allocation7 + $0xa]]  ;;  %v132_v36 = vstv %s570_s22 }
  0x28   :  { %s360_s30 = sld [smem:[#allocation7 + $0xb]]  ;;  %v136_v46 = vstv %s576_s25 }
  0x29   :  { %v108_v37 = vadd.f32 %v107_v32, %v93_v26  ;;  %v119_v38 = vmax.f32 %v118_v33, 0.0  ;;  %v130_v39 = vadd.f32 %v129_v34, %v126_v30  ;;  %v140_v40 = vstv %s355_s26  ;;  %s589_s6 = sld [smem:[#allocation8 + $0x5]] }
  0x2a   :  { %v141_v41 = vmul.f32 %v140_v40, %v555_v0  ;;  %v143_v42 = vstv %s356_s27  ;;  %s592_s2 = sld [smem:[#allocation10 + $0x5]] }
  0x2b   :  { %v122_v43 = vmul.f32 %v121_v35, %v119_v38  ;;  %v133_v44 = vadd.f32 %v132_v36, %v130_v39  ;;  %v144_v45 = vmul.f32 %v143_v42, %v557_v1  ;;  %s363_s7 = sld [smem:[#allocation7 + $0xc]]  ;;  %v147_v47 = vstv %s581_s4 }
  0x2c   :  { %s364_s8 = sld [smem:[#allocation7 + $0xd]]  ;;  %v151_v57 = vstv %s584_s28 }
  0x2d   :  { %v123_v48 = vadd.f32 %v122_v43, %v108_v37  ;;  %v134_v49 = vmax.f32 %v133_v44, 0.0  ;;  %v145_v50 = vadd.f32 %v144_v45, %v141_v41  ;;  %v155_v51 = vstv %s359_s29  ;;  %s597_s9 = sld [smem:[#allocation8 + $0x6]] }
  0x2e   :  { %v156_v52 = vmul.f32 %v155_v51, %v555_v0  ;;  %v158_v53 = vstv %s360_s30  ;;  %s600_s0 = sld [smem:[#allocation10 + $0x6]] }
  0x2f   :  { %v137_v54 = vmul.f32 %v136_v46, %v134_v49  ;;  %v148_v55 = vadd.f32 %v147_v47, %v145_v50  ;;  %v159_v56 = vmul.f32 %v158_v53, %v557_v1  ;;  %s367_s10 = sld [smem:[#allocation7 + $0xe]]  ;;  %v162_v58 = vstv %s589_s6 }
  0x30   :  { %s368_s11 = sld [smem:[#allocation7 + $0xf]]  ;;  %v166_v6 = vstv %s592_s2 }
  0x31   :  { %v138_v59 = vadd.f32 %v137_v54, %v123_v48  ;;  %v149_v60 = vmax.f32 %v148_v55, 0.0  ;;  %v160_v61 = vadd.f32 %v159_v56, %v156_v52  ;;  %v170_v62 = vstv %s363_s7  ;;  %s605_s1 = sld [smem:[#allocation8 + $0x7]] }
  0x32   :  { %v171_v63 = vmul.f32 %v170_v62, %v555_v0  ;;  %v173_v2 = vstv %s364_s8  ;;  %s608_s12 = sld [smem:[#allocation10 + $0x7]] }
  0x33   :  { %v152_v3 = vmul.f32 %v151_v57, %v149_v60  ;;  %v163_v4 = vadd.f32 %v162_v58, %v160_v61  ;;  %v174_v5 = vmul.f32 %v173_v2, %v557_v1  ;;  %s371_s3 = sld [smem:[#allocation7 + $0x10]]  ;;  %v177_v7 = vstv %s597_s9 }
  0x34   :  { %s372_s13 = sld [smem:[#allocation7 + $0x11]]  ;;  %v181_v17 = vstv %s600_s0 }
  0x35   :  { %v153_v8 = vadd.f32 %v152_v3, %v138_v59  ;;  %v164_v9 = vmax.f32 %v163_v4, 0.0  ;;  %v175_v10 = vadd.f32 %v174_v5, %v171_v63  ;;  %v185_v11 = vstv %s367_s10  ;;  %s613_s14 = sld [smem:[#allocation8 + $0x8]] }
  0x36   :  { %v186_v12 = vmul.f32 %v185_v11, %v555_v0  ;;  %v188_v13 = vstv %s368_s11  ;;  %s616_s15 = sld [smem:[#allocation10 + $0x8]] }
  0x37   :  { %v167_v14 = vmul.f32 %v166_v6, %v164_v9  ;;  %v178_v15 = vadd.f32 %v177_v7, %v175_v10  ;;  %v189_v16 = vmul.f32 %v188_v13, %v557_v1  ;;  %s375_s16 = sld [smem:[#allocation7 + $0x12]]  ;;  %v192_v18 = vstv %s605_s1 }
  0x38   :  { %s376_s17 = sld [smem:[#allocation7 + $0x13]]  ;;  %v196_v28 = vstv %s608_s12 }
  0x39   :  { %v168_v19 = vadd.f32 %v167_v14, %v153_v8  ;;  %v179_v20 = vmax.f32 %v178_v15, 0.0  ;;  %v190_v21 = vadd.f32 %v189_v16, %v186_v12  ;;  %v200_v22 = vstv %s371_s3  ;;  %s621_s18 = sld [smem:[#allocation8 + $0x9]] }
  0x3a   :  { %v201_v23 = vmul.f32 %v200_v22, %v555_v0  ;;  %v203_v24 = vstv %s372_s13  ;;  %s624_s19 = sld [smem:[#allocation10 + $0x9]] }
  0x3b   :  { %v182_v25 = vmul.f32 %v181_v17, %v179_v20  ;;  %v193_v26 = vadd.f32 %v192_v18, %v190_v21  ;;  %v204_v27 = vmul.f32 %v203_v24, %v557_v1  ;;  %s379_s20 = sld [smem:[#allocation7 + $0x14]]  ;;  %v207_v29 = vstv %s613_s14  ;;  %s510_s14 = smov [#allocation11]  }
  0x3c   :  { %s380_s21 = sld [smem:[#allocation7 + $0x15]]  ;;  %v211_v39 = vstv %s616_s15  ;;  %s328_s15 = sshll.u32 %s510_s14, 4  ;;  %s329_s15 = int_to_ptr.vmem [resolvable:$true] %s328_s15 }
  0x3d   :  { %v183_v30 = vadd.f32 %v182_v25, %v168_v19  ;;  %v194_v31 = vmax.f32 %v193_v26, 0.0  ;;  %v205_v32 = vadd.f32 %v204_v27, %v201_v23  ;;  %v215_v33 = vstv %s375_s16  ;;  %s629_s22 = sld [smem:[#allocation8 + $0xa]] }
  0x3e   :  { %v216_v34 = vmul.f32 %v215_v33, %v555_v0  ;;  %v218_v35 = vstv %s376_s17  ;;  %s632_s23 = sld [smem:[#allocation10 + $0xa]] }
  0x3f   :  { %v197_v36 = vmul.f32 %v196_v28, %v194_v31  ;;  %v208_v37 = vadd.f32 %v207_v29, %v205_v32  ;;  %v219_v38 = vmul.f32 %v218_v35, %v557_v1  ;;  %s383_s24 = sld [smem:[#allocation7 + $0x16]]  ;;  %v222_v40 = vstv %s621_s18  ;;  %s330_s18 = sshll.u32 %s684_s5, 4  ;;  %s331_s18 = int_to_ptr.hbm [resolvable:$true] %s330_s18 }
  0x40   :  { %s384_s25 = sld [smem:[#allocation7 + $0x17]]  ;;  %v226_v50 = vstv %s624_s19 }
  0x41   :  { %v198_v41 = vadd.f32 %v197_v36, %v183_v30  ;;  %v209_v42 = vmax.f32 %v208_v37, 0.0  ;;  %v220_v43 = vadd.f32 %v219_v38, %v216_v34  ;;  %v230_v44 = vstv %s379_s20  ;;  %s637_s26 = sld [smem:[#allocation8 + $0xb]] }
  0x42   :  { %v231_v45 = vmul.f32 %v230_v44, %v555_v0  ;;  %v233_v46 = vstv %s380_s21  ;;  %s640_s27 = sld [smem:[#allocation10 + $0xb]] }
  0x43   :  { %v212_v47 = vmul.f32 %v211_v39, %v209_v42  ;;  %v223_v48 = vadd.f32 %v222_v40, %v220_v43  ;;  %v234_v49 = vmul.f32 %v233_v46, %v557_v1  ;;  %s387_s4 = sld [smem:[#allocation7 + $0x18]]  ;;  %v237_v51 = vstv %s629_s22 }
  0x44   :  { %s388_s28 = sld [smem:[#allocation7 + $0x19]]  ;;  %v241_v61 = vstv %s632_s23 }
  0x45   :  { %v213_v52 = vadd.f32 %v212_v47, %v198_v41  ;;  %v224_v53 = vmax.f32 %v223_v48, 0.0  ;;  %v235_v54 = vadd.f32 %v234_v49, %v231_v45  ;;  %v245_v55 = vstv %s383_s24  ;;  %s645_s29 = sld [smem:[#allocation8 + $0xc]] }
  0x46   :  { %v246_v56 = vmul.f32 %v245_v55, %v555_v0  ;;  %v248_v57 = vstv %s384_s25  ;;  %s648_s30 = sld [smem:[#allocation10 + $0xc]] }
  0x47   :  { %v227_v58 = vmul.f32 %v226_v50, %v224_v53  ;;  %v238_v59 = vadd.f32 %v237_v51, %v235_v54  ;;  %v249_v60 = vmul.f32 %v248_v57, %v557_v1  ;;  %s391_s6 = sld [smem:[#allocation7 + $0x1a]]  ;;  %v252_v62 = vstv %s637_s26 }
  0x48   :  { %s392_s2 = sld [smem:[#allocation7 + $0x1b]]  ;;  %v256_v10 = vstv %s640_s27 }
  0x49   :  { %v228_v63 = vadd.f32 %v227_v58, %v213_v52  ;;  %v239_v2 = vmax.f32 %v238_v59, 0.0  ;;  %v250_v3 = vadd.f32 %v249_v60, %v246_v56  ;;  %v260_v4 = vstv %s387_s4  ;;  %s653_s7 = sld [smem:[#allocation8 + $0xd]] }
  0x4a   :  { %v261_v5 = vmul.f32 %v260_v4, %v555_v0  ;;  %v263_v6 = vstv %s388_s28  ;;  %s656_s8 = sld [smem:[#allocation10 + $0xd]] }
  0x4b   :  { %v242_v7 = vmul.f32 %v241_v61, %v239_v2  ;;  %v253_v8 = vadd.f32 %v252_v62, %v250_v3  ;;  %v264_v9 = vmul.f32 %v263_v6, %v557_v1  ;;  %s395_s9 = sld [smem:[#allocation7 + $0x1c]]  ;;  %v267_v11 = vstv %s645_s29 }
  0x4c   :  { %s396_s0 = sld [smem:[#allocation7 + $0x1d]]  ;;  %v271_v21 = vstv %s648_s30 }
  0x4d   :  { %v243_v12 = vadd.f32 %v242_v7, %v228_v63  ;;  %v254_v13 = vmax.f32 %v253_v8, 0.0  ;;  %v265_v14 = vadd.f32 %v264_v9, %v261_v5  ;;  %v275_v15 = vstv %s391_s6  ;;  %s661_s10 = sld [smem:[#allocation8 + $0xe]] }
  0x4e   :  { %v276_v16 = vmul.f32 %v275_v15, %v555_v0  ;;  %v278_v17 = vstv %s392_s2  ;;  %s664_s11 = sld [smem:[#allocation10 + $0xe]] }
  0x4f   :  { %v257_v18 = vmul.f32 %v256_v10, %v254_v13  ;;  %v268_v19 = vadd.f32 %v267_v11, %v265_v14  ;;  %v279_v20 = vmul.f32 %v278_v17, %v557_v1  ;;  %s399_s1 = sld [smem:[#allocation7 + $0x1e]]  ;;  %v282_v22 = vstv %s653_s7 }
  0x50   :  { %s400_s12 = sld [smem:[#allocation7 + $0x1f]]  ;;  %v286_v32 = vstv %s656_s8 }
  0x51   :  { %v258_v23 = vadd.f32 %v257_v18, %v243_v12  ;;  %v269_v24 = vmax.f32 %v268_v19, 0.0  ;;  %v280_v25 = vadd.f32 %v279_v20, %v276_v16  ;;  %v290_v26 = vstv %s395_s9  ;;  %s401_s3 = sld [smem:[#allocation8 + $0xf]] }
  0x52   :  { %v291_v27 = vmul.f32 %v290_v26, %v555_v0  ;;  %v293_v28 = vstv %s396_s0  ;;  %s402_s13 = sld [smem:[#allocation10 + $0xf]] }
  0x53   :  { %v272_v29 = vmul.f32 %v271_v21, %v269_v24  ;;  %v283_v30 = vadd.f32 %v282_v22, %v280_v25  ;;  %v294_v31 = vmul.f32 %v293_v28, %v557_v1  ;;  %v297_v33 = vstv %s661_s10 }
  0x54   :  { %v301_v43 = vstv %s664_s11 }
  0x55   :  { %v273_v34 = vadd.f32 %v272_v29, %v258_v23  ;;  %v284_v35 = vmax.f32 %v283_v30, 0.0  ;;  %v295_v36 = vadd.f32 %v294_v31, %v291_v27  ;;  %v305_v37 = vstv %s399_s1 }
  0x56   :  { %v306_v38 = vmul.f32 %v305_v37, %v555_v0  ;;  %v308_v39 = vstv %s400_s12 }
  0x57   :  { %v287_v40 = vmul.f32 %v286_v32, %v284_v35  ;;  %v298_v41 = vadd.f32 %v297_v33, %v295_v36  ;;  %v309_v42 = vmul.f32 %v308_v39, %v557_v1  ;;  %v312_v44 = vstv %s401_s3 }
  0x58   :  { %v316_v50 = vstv %s402_s13 }
  0x59   :  { %v288_v45 = vadd.f32 %v287_v40, %v273_v34  ;;  %v299_v46 = vmax.f32 %v298_v41, 0.0  ;;  %v310_v47 = vadd.f32 %v309_v42, %v306_v38 }
  0x5b   :  { %v302_v48 = vmul.f32 %v301_v43, %v299_v46  ;;  %v313_v49 = vadd.f32 %v312_v44, %v310_v47 }
  0x5d   :  { %v303_v51 = vadd.f32 %v302_v48, %v288_v45  ;;  %v314_v52 = vmax.f32 %v313_v49, 0.0 }
  0x5f   :  { %v317_v53 = vmul.f32 %v316_v50, %v314_v52 }
  0x61   :  { %v318_v54 = vadd.f32 %v317_v53, %v303_v51 }
  0x63   :  { %410 = vtanh.f32 %v318_v54 }
  0x69   :  { %v411_v55 = vpop.eup %410 }
  0x6a   :  { %v320_v0 = vmul.f32 0.5, %v411_v55 }
  0x6c   :  { %v321_v1 = vadd.f32 0.5, %v320_v0 }
  0x6e   :  { %322 = vst [vmem:[#allocation11] sm:$0xff] %v321_v1 }
  0x6f   :  { %333 = dma.vmem_to_hbm [thread:$0]  %s329_s15, 128, %s331_s18, [#allocation5]  }
  0x70   :  { %502 = dma.done.wait [#allocation5], 128  }
  0x71   :  { %503 = vsyncadd [#allocation5], 4294967168 }
  0x72   :  { %338 = vsyncpa [#allocation4], 1 }
  0x73   :  { %339 = vsyncpa [#allocation5], 1 }
  0x74   :  { %340 = vsyncpa [#allocation6], 1 }
  0x75   :  { %341 = vsyncpa [#allocation9], 1 }

</bundles_post_ra>
